<compile_context>
chip_gen: v5e
topology: v5e:2x2
jax: 0.10.0
libtpu: 0.0.40
codegen_flags: <defaults>
</compile_context>

<pallas_src>
import functools

import jax
import jax.numpy as jnp
from jax.experimental import pallas as pl
from jax.experimental.pallas import tpu as pltpu


def _round_up(x: int, m: int) -> int:
    return (x + m - 1) // m * m


def _cdiv(a: int, b: int) -> int:
    return (a + b - 1) // b


def _pick_tile(padded_dim: int, max_tile: int, prefer_two_tiles: bool) -> int:
    """Largest multiple-of-128 tile that divides `padded_dim` and is <= max_tile.

    When `prefer_two_tiles`, prefer the largest such tile that still yields
    >= 2 tiles (keeps both v7x TensorCores busy); otherwise just the largest.
    Never returns < 128 (v5e: keep output stores lane-dense / unmasked).
    """
    units = padded_dim // 128
    divisors = [d * 128 for d in range(1, units + 1) if units % d == 0]
    candidates = [t for t in divisors if t <= max_tile] or [128]
    best = max(candidates)
    if prefer_two_tiles:
        multi = [t for t in candidates if padded_dim // t >= 2]
        if multi:
            best = max(multi)
    return best


def _fullk_kernel(x_ref, w_ref, b_ref, o_ref):
    # x_ref: [tm, Kp] bf16   w_ref: [Kp, tn] bf16   b_ref: [1, tn] f32
    # Single MXU matmul per tile; bias fused into the (lane-dense) store.
    o_ref[...] = (jnp.dot(x_ref[...], w_ref[...],
                          preferred_element_type=jnp.float32)
                  + b_ref[...]).astype(o_ref.dtype)


def _ktiled_kernel(x_ref, w_ref, b_ref, o_ref, acc_ref):
    # Fallback for very large K: f32 accumulator resident across the K axis.
    @pl.when(pl.program_id(2) == 0)
    def _():
        acc_ref[...] = jnp.zeros_like(acc_ref)

    acc_ref[...] += jnp.dot(x_ref[...], w_ref[...],
                            preferred_element_type=jnp.float32)

    @pl.when(pl.program_id(2) == pl.num_programs(2) - 1)
    def _():
        o_ref[...] = (acc_ref[...] + b_ref[...]).astype(o_ref.dtype)


_VMEM_BUDGET = 40 * 1024 * 1024   # conservative: fits v7x's 64 MiB/TC VMEM
_VMEM_LIMIT = 48 * 1024 * 1024
_TM_CAP = 512
_TN_MAX = 512
_TK_MAX = 512


@functools.partial(jax.jit, static_argnames=("n_out",))
def linear_pool(reps: jax.Array, weight_p: jax.Array, bias_p: jax.Array,
                *, n_out: int) -> jax.Array:
    """Tied linear pooler projection: reps @ W + b, via Pallas.

    reps:     [M, K]    any float dtype (cast to the weight dtype for the MXU)
    weight_p: [Kp, Np]  pre-padded (multiples of 128), ideally bf16
    bias_p:   [1, Np]   pre-padded, f32
    n_out:    logical output dim (<= Np); result is [M, n_out] in reps.dtype
    """
    M, K = reps.shape
    Kp, Np = weight_p.shape
    assert Kp % 128 == 0 and Np % 128 == 0 and K <= Kp and n_out <= Np
    out_dtype = reps.dtype
    out_itemsize = jnp.dtype(out_dtype).itemsize
    compute_dtype = weight_p.dtype

    # --- M tiling: fewest 16-row-aligned tiles (bf16 sublane packing). ------
    num_m = _cdiv(M, _TM_CAP)
    tm = _round_up(_cdiv(M, num_m), 16)
    Mp = tm * num_m

    # --- N tiling: divisor of Np, lane-dense, >=2 tiles when possible. ------
    tn = _pick_tile(Np, _TN_MAX, prefer_two_tiles=True)
    num_n = Np // tn

    # Activations: cast to weight dtype; pad only if needed (weight/bias are
    # pre-padded in the pooler, never touched here).
    x = reps.astype(compute_dtype)
    if (Mp, Kp) != (M, K):
        x = jnp.pad(x, ((0, Mp - M), (0, Kp - K)))

    w_item = jnp.dtype(compute_dtype).itemsize
    fullk_vmem = 2 * (tm * Kp * w_item + Kp * tn * w_item + tn * 4
                      + tm * tn * out_itemsize)

    if fullk_vmem <= _VMEM_BUDGET:
        # ---- Full-K path: no K grid axis, no accumulator scratch. ----------
        grid = (num_m, num_n)
        cost = pl.CostEstimate(
            flops=2 * Mp * Kp * Np,
            transcendentals=0,
            bytes_accessed=(Mp * Kp * w_item            # activations, once
                            + num_m * Kp * Np * w_item  # weight, once per M tile
                            + Np * 4
                            + Mp * Np * out_itemsize),
        )
        out = pl.pallas_call(
            _fullk_kernel,
            out_shape=jax.ShapeDtypeStruct((Mp, Np), out_dtype),
            grid_spec=pltpu.PrefetchScalarGridSpec(
                num_scalar_prefetch=0,
                grid=grid,
                in_specs=[
                    pl.BlockSpec((tm, Kp), lambda i, j: (i, 0)),  # activations
                    pl.BlockSpec((Kp, tn), lambda i, j: (0, j)),  # weight panel
                    pl.BlockSpec((1, tn), lambda i, j: (0, j)),   # bias row
                ],
                out_specs=pl.BlockSpec((tm, tn), lambda i, j: (i, j)),
            ),
            compiler_params=pltpu.CompilerParams(
                dimension_semantics=("parallel", "parallel"),
                vmem_limit_bytes=_VMEM_LIMIT,
            ),
            cost_estimate=cost,
        )(x, weight_p, bias_p)
    else:
        # ---- Fallback for very large K: K-tiled with f32 accumulator. ------
        tk = _pick_tile(Kp, _TK_MAX, prefer_two_tiles=False)
        num_k = Kp // tk
        grid = (num_m, num_n, num_k)
        cost = pl.CostEstimate(
            flops=2 * Mp * Kp * Np,
            transcendentals=0,
            bytes_accessed=(num_n * Mp * Kp * w_item
                            + num_m * Kp * Np * w_item
                            + Np * 4
                            + Mp * Np * out_itemsize),
        )
        out = pl.pallas_call(
            _ktiled_kernel,
            out_shape=jax.ShapeDtypeStruct((Mp, Np), out_dtype),
            grid_spec=pltpu.PrefetchScalarGridSpec(
                num_scalar_prefetch=0,
                grid=grid,
                in_specs=[
                    pl.BlockSpec((tm, tk), lambda i, j, k: (i, k)),
                    pl.BlockSpec((tk, tn), lambda i, j, k: (k, j)),
                    pl.BlockSpec((1, tn), lambda i, j, k: (0, j)),
                ],
                out_specs=pl.BlockSpec((tm, tn), lambda i, j, k: (i, j)),
                scratch_shapes=[pltpu.VMEM((tm, tn), jnp.float32)],
            ),
            compiler_params=pltpu.CompilerParams(
                dimension_semantics=("parallel", "parallel", "arbitrary"),
                vmem_limit_bytes=_VMEM_LIMIT,
            ),
            cost_estimate=cost,
        )(x, weight_p, bias_p)

    return out[:M, :n_out]


class EncoderPoolerPallas:
    """JAX/Pallas mirror of tevatron's (concrete, tied) EncoderPooler."""

    def __init__(self, input_dim: int, output_dim: int, key: jax.Array,
                 param_dtype=jnp.bfloat16):
        kw, kb = jax.random.split(key)
        # Deterministic init (stand-in for pooler.pt weights). Weight kept in
        # bf16: this op is weight-HBM-stream bound, bf16 halves bytes moved
        # and is the native MXU input dtype on v5e/v6e/v7x.
        self.weight = (jax.random.normal(kw, (input_dim, output_dim), jnp.float32)
                       * (1.0 / jnp.sqrt(input_dim))).astype(param_dtype)
        self.bias = jax.random.normal(kb, (output_dim,), jnp.float32) * 0.01

        # Pre-pad + pre-cast ONCE so the kernel never pays a per-call K x N
        # HBM read+write for weight padding and never streams padded panels
        # beyond the next multiple of 128.
        kp = _round_up(input_dim, 128)
        np_ = _round_up(output_dim, 128)
        self.weight_padded = jnp.pad(
            self.weight, ((0, kp - input_dim), (0, np_ - output_dim)))
        self.bias_padded = jnp.pad(
            self.bias.astype(jnp.float32), (0, np_ - output_dim)).reshape(1, np_)

        self._config = {"input_dim": input_dim, "output_dim": output_dim,
                        "tied": True}

    def __call__(self, q_reps=None, p_reps=None):
        n_out = self._config["output_dim"]
        # Fuse q/p projections into one kernel call so the (dominant) weight
        # stream is read from HBM only once.
        if q_reps is not None and p_reps is not None:
            reps = jnp.concatenate([q_reps, p_reps], axis=0)
            out = linear_pool(reps, self.weight_padded, self.bias_padded,
                              n_out=n_out)
            bq = q_reps.shape[0]
            return out[:bq], out[bq:]
        if q_reps is not None:
            return linear_pool(q_reps, self.weight_padded, self.bias_padded,
                               n_out=n_out), None
        if p_reps is not None:
            return None, linear_pool(p_reps, self.weight_padded,
                                     self.bias_padded, n_out=n_out)
        return None, None


def _reference_pool(x, w, b):
    return (jnp.dot(x.astype(w.dtype), w, preferred_element_type=jnp.float32)
            + b.astype(jnp.float32)).astype(x.dtype)


if __name__ == "__main__":
    key = jax.random.PRNGKey(0)
    k_q, k_p, k_pool, k_q2, k_p2, k_pool2 = jax.random.split(key, 6)

    # Main check: lane-dense shapes (no weight-padding path; 2 N tiles).
    batch_q, batch_p, hidden, out_dim = 8, 16, 256, 256
    q_reps = jax.random.normal(k_q, (batch_q, hidden), jnp.float32)
    p_reps = jax.random.normal(k_p, (batch_p, hidden), jnp.float32)

    pooler = EncoderPoolerPallas(hidden, out_dim, k_pool)
    q_out, p_out = pooler(q_reps, p_reps)
    jax.block_until_ready((q_out, p_out))

    q_ref = _reference_pool(q_reps, pooler.weight, pooler.bias)
    p_ref = _reference_pool(p_reps, pooler.weight, pooler.bias)
    assert q_out.shape == (batch_q, out_dim) and p_out.shape == (batch_p, out_dim)
    assert jnp.allclose(q_out, q_ref, atol=1e-2, rtol=1e-2)
    assert jnp.allclose(p_out, p_ref, atol=1e-2, rtol=1e-2)

    # Secondary check: ragged dims exercise the pre-padded weight / slice-back
    # path (hidden=80 -> Kp=128, out=96 -> Np=128, M=12 -> tm=16).
    bq2, bp2, hidden2, out2 = 5, 7, 80, 96
    q2 = jax.random.normal(k_q2, (bq2, hidden2), jnp.float32)
    p2 = jax.random.normal(k_p2, (bp2, hidden2), jnp.float32)
    pooler2 = EncoderPoolerPallas(hidden2, out2, k_pool2)
    q2_out, p2_out = pooler2(q2, p2)
    jax.block_until_ready((q2_out, p2_out))
    assert q2_out.shape == (bq2, out2) and p2_out.shape == (bp2, out2)
    assert jnp.allclose(q2_out, _reference_pool(q2, pooler2.weight, pooler2.bias),
                        atol=1e-2, rtol=1e-2)
    assert jnp.allclose(p2_out, _reference_pool(p2, pooler2.weight, pooler2.bias),
                        atol=1e-2, rtol=1e-2)

    print("KERNEL_OK")
</pallas_src>

<mosaic_0001>
module attributes {stable_mosaic.version = 11 : i64} {
  func.func @_fullk_kernel(%arg0: i32, %arg1: i32, %arg2: memref<32x256xbf16, #tpu.memory_space<vmem>>, %arg3: memref<256x128xbf16, #tpu.memory_space<vmem>>, %arg4: memref<1x128xf32, #tpu.memory_space<vmem>>, %arg5: memref<32x128xf32, #tpu.memory_space<vmem>>) attributes {dimension_semantics = [#tpu.dimension_semantics<parallel>, #tpu.dimension_semantics<parallel>], iteration_bounds = array<i64: 1, 2>, scalar_prefetch = 0 : i64, scratch_operands = 0 : i64, tpu.core_type = #tpu.core_type<tc>, window_params = [{transform_indices = @transform_0, window_bounds = array<i64: 32, 256>}, {transform_indices = @transform_1, window_bounds = array<i64: 256, 128>}, {transform_indices = @transform_2, window_bounds = array<i64: 1, 128>}, {transform_indices = @transform_3, window_bounds = array<i64: 32, 128>}]} {
    %c0 = arith.constant 0 : index
    %c0_0 = arith.constant 0 : index
    %0 = vector.load %arg2[%c0, %c0_0] : memref<32x256xbf16, #tpu.memory_space<vmem>>, vector<32x256xbf16>
    %c0_1 = arith.constant 0 : index
    %c0_2 = arith.constant 0 : index
    %1 = vector.load %arg3[%c0_1, %c0_2] : memref<256x128xbf16, #tpu.memory_space<vmem>>, vector<256x128xbf16>
    %cst = arith.constant dense<0.000000e+00> : vector<32x128xf32>
    %2 = tpu.matmul %0, %1, %cst {dimension_numbers = #tpu.dot_dimension_numbers<[1], [0], [0], [1], [0, 0, 1, 1], [], []>} : vector<32x256xbf16>, vector<256x128xbf16>, vector<32x128xf32> -> vector<32x128xf32>
    %c0_3 = arith.constant 0 : index
    %c0_4 = arith.constant 0 : index
    %3 = vector.load %arg4[%c0_3, %c0_4] : memref<1x128xf32, #tpu.memory_space<vmem>>, vector<1x128xf32>
    %4 = vector.broadcast %3 : vector<1x128xf32> to vector<32x128xf32>
    %5 = arith.addf %2, %4 : vector<32x128xf32>
    %c0_5 = arith.constant 0 : index
    %c0_6 = arith.constant 0 : index
    %6 = vector.load %arg5[%c0_5, %c0_6] : memref<32x128xf32, #tpu.memory_space<vmem>>, vector<32x128xf32>
    tpu.vector_store %arg5[%c0_5, %c0_6], %5 {strides = array<i32>} : memref<32x128xf32, #tpu.memory_space<vmem>>, vector<32x128xf32>,
    return
  }
  func.func @transform_0(%arg0: i32, %arg1: i32) -> (i32, i32) {
    %c0_i32 = arith.constant 0 : i32
    %c0_i32_0 = arith.constant 0 : i32
    return %arg0, %c0_i32 : i32, i32
  }
  func.func @transform_1(%arg0: i32, %arg1: i32) -> (i32, i32) {
    %c0_i32 = arith.constant 0 : i32
    %c0_i32_0 = arith.constant 0 : i32
    return %c0_i32, %arg1 : i32, i32
  }
  func.func @transform_2(%arg0: i32, %arg1: i32) -> (i32, i32) {
    %c0_i32 = arith.constant 0 : i32
    %c0_i32_0 = arith.constant 0 : i32
    return %c0_i32, %arg1 : i32, i32
  }
  func.func @transform_3(%arg0: i32, %arg1: i32) -> (i32, i32) {
    %c0_i32 = arith.constant 0 : i32
    return %arg0, %arg1 : i32, i32
  }
}

</mosaic_0001>

<bundles_post_ra>
// kernel: linear_pool.1
= control target key start
LH: loop header
LB: loop body
LE: loop exit
PB: predicated region body
PF: predicated region fallthrough
CT: control target
= control target key end

     0   :  { %8 = vsyncpa [#allocation3], 0  ;;  %s1038_s0 = inlined_call_operand.vmem [shape: bf16[32,256], index: 0, kind: input, shape index: {}]   ;;  %s1039_s1 = inlined_call_operand.hbm [shape: bf16[256,256], index: 1, kind: input, shape index: {}]   ;;  %s1040_s2 = inlined_call_operand.vmem [shape: f32[1,256], index: 2, kind: input, shape index: {}]   ;;  %s1041_s3 = inlined_call_operand.vmem [shape: f32[32,256], index: 3, kind: output, shape index: {}]  }
   0x1   :  { %10 = vsyncpa [#allocation3 + $0x1], 0  ;;  %s885_s12 = smov 0   ;;  %s887_s13 = smov 0  }
   0x2   :  { %s889_s14 = smov 0   ;;  %s891_s15 = smov 0  }
   0x3   :  { %s893_s16 = smov 0   ;;  %s895_s17 = smov 0  }
   0x4 LB: > { %s591_s18 = sadd.s32 4294967295, %s860_s17   ;;  %s25_s19 = sadd.s32 1, %s856_s16  ;;  %s860_s17 = sphi %s895_s17, %s16_s17   ;;  %s856_s16 = sphi %s893_s16, %s1049_s16   ;;  %s852_s15 = sphi %s891_s15, %s1048_s15   ;;  %s848_s14 = sphi %s889_s14, %s1047_s14   ;;  %s844_s13 = sphi %s887_s13, %s1046_s13   ;;  %s840_s12 = sphi %s885_s12, %s1045_s12  }
   0x5   : > { %p26_p0 = scmp.ge.s32.totalorder %s25_s19, 2  ;;  %s61_s20 = sadd.s32 1, %s848_s14 }
   0x6   : > { %p68_p1 = scmp.ne.s32.totalorder %s848_s14, %s844_s13  ;;  %p69_p2 = scmp.eq.s32.totalorder %s860_s17, 0 }
   0x7   : > { %s1051_s19 = smov (%p26_p0, %s25_s19), 0  ;;  %p74_p4 = scmp.ne.s32.totalorder %s844_s13, %s840_s12 }
   0x8   : > { %p921_p3 = por %p69_p2, %p68_p1  ;;  %s58_s22 = ssub.s32 %s856_s16, %s1051_s19 }
   0x9   : > { %p75_p5 = scmp.eq.s32.totalorder %s591_s18, 0  ;;  %p59_p6 = scmp.eq.s32.totalorder %s58_s22, 0 }
   0xa   : > { %p126_p7 = scmp.eq.s32.totalorder %s591_s18, 1  ;;  %p727_p10 = scmp.lt.s32.totalorder %s860_s17, 2 }
   0xb   : > { %p928_p8 = por %p75_p5, %p74_p4  ;;  %s162_s26 = sand.u32 1, %s848_s14  }
   0xc   : > { %s933_s24 = scalar_select %p59_p6, %s848_s14, %s61_s20  }
   0xd   : > { %p935_p9 = por %p126_p7, %p68_p1  ;;  %s597_s27 = sshll.u32 %s856_s16, 2 }
   0xe   : > { %s596_s28 = sshll.u32 %s162_s26, 7  ;;  %s170_s4 = scalar_lea.hbm %s1039_s1, %s597_s27 }
   0xf   : > { %s171_s5 = sshll.u32 %s170_s4, 4  ;;  %s166_s6 = scalar_lea.vmem [#allocation2], %s596_s28  ;;  %s172_s5 = int_to_ptr.hbm [resolvable:$true] %s171_s5 }
  0x10   : > { %s173_s7 = sshll.u32 %s166_s6, 4  ;;  %p724_p11 = pnand %p727_p10, %p921_p3  ;;  %s174_s7 = int_to_ptr.vmem [resolvable:$true] %s173_s7 }
  0x11   : > { %p598_p12 = scmp.ge.s32.totalorder %s860_s17, 1  ;;  %s163_s8 = scalar_lea.sflag [#allocation3], %s162_s26 }
  0x12   : > { %s862_s9 = smov 128   ;;  %s863_s10 = smov 64  }
  0x13   : > { %s864_s11 = smov 4   ;;  %p187_p13 = scmp.lt.s32.totalorder %s860_s17, 3 }
  0x14   : > { %726 = dma.hbm_to_vmem [thread:$0]  (!%p724_p11), %s172_s5, 2048, %s174_s7, %s163_s8, %s862_s9, %s863_s10, %s864_s11  }
  0x15   : > { %p188_p0 = pnand %p598_p12, %p187_p13 }
  0x16   : > { %s950_s12 = sand.u32 (!%p188_p0), 1, %s844_s13  }
  0x17   : > { %191 = sbr.rel (%p188_p0) target bundleno = 214 (0xd6), region = 32  ;;  %s599_s18 = sshll.u32 (!%p188_p0), %s950_s12, 7 }
  0x18   : > { %s194_s20 = scalar_lea.sflag (!%p188_p0), [#allocation3], %s950_s12  ;;  %s954_s22 = scalar_lea.vmem (!%p188_p0), [#allocation2], %s599_s18 }
  0x1c   : > { %835 = dma.done.wait (%p928_p8), %s194_s20, 2048  }
  0x1d   : > { %837 = vsyncadd (%p928_p8), %s194_s20, 4294965248  ;;  %p236_p1 = scmp.lt.s32.totalorder %s852_s15, 1  ;;  %v696_v0 = vld [vmem:[%s954_s22 + $0x38] sm:$0xff]  ;;  %v695_v2 = vld [vmem:[%s954_s22 + $0x30] sm:$0xff]  ;;  %s600_s30 = sshll.u32 %s950_s12, 5 }
  0x1e   : > { %v704_v1 = vld [vmem:[%s954_s22 + $0x78] sm:$0xff]  ;;  %396 = vmatpush.bf16.msra.mxu0 %v696_v0  ;;  %705 = vmatpush.bf16.msra.mxu2 %v696_v0  ;;  %v703_v3 = vld [vmem:[%s954_s22 + $0x70] sm:$0xff]  ;;  %v694_v4 = vld [vmem:[%s954_s22 + $0x28] sm:$0xff]  ;;  %s228_s4 = scalar_lea.vmem [#allocation4], %s600_s30  ;;  %s682_s12 = sshll.u32 (%p935_p9), %s852_s15, 3 }
  0x1f   : > { %415 = vmatpush.bf16.msra.mxu1 %v704_v1  ;;  %713 = vmatpush.bf16.msra.mxu3 %v704_v1  ;;  %s966_s21 = scalar_select %p236_p1, %s852_s15, 1  ;;  %v702_v5 = vld [vmem:[%s954_s22 + $0x68] sm:$0xff]  ;;  %v693_v6 = vld [vmem:[%s954_s22 + $0x20] sm:$0xff]  ;;  %v692_v8 = vld [vmem:[%s954_s22 + $0x18] sm:$0xff] }
  0x20   : > { %v701_v7 = vld [vmem:[%s954_s22 + $0x60] sm:$0xff]  ;;  %v700_v9 = vld [vmem:[%s954_s22 + $0x58] sm:$0xff]  ;;  %v691_v10 = vld [vmem:[%s954_s22 + $0x10] sm:$0xff]  ;;  %s449_s5 = scalar_lea.vmem (%p935_p9), %s1041_s3, %s682_s12 }
  0x21   : > { %s238_s27 = scalar_lea.vmem %s1040_s2, %s966_s21  ;;  %v699_v11 = vld [vmem:[%s954_s22 + $0x50] sm:$0xff]  ;;  %v690_v12 = vld [vmem:[%s954_s22 + $0x8] sm:$0xff]  ;;  %v689_v14 = vld [vmem:[%s954_s22] sm:$0xff] }
  0x22   : > { %397 = vmatpush.bf16.msra.mxu0 %v695_v2  ;;  %706 = vmatpush.bf16.msra.mxu2 %v695_v2  ;;  %v698_v13 = vld [vmem:[%s954_s22 + $0x48] sm:$0xff]  ;;  %v697_v15 = vld [vmem:[%s954_s22 + $0x40] sm:$0xff]  ;;  %v611_v18 = vld [vmem:[%s1038_s0 + $0x10] sm:$0xf] }
  0x23   : > { %416 = vmatpush.bf16.msra.mxu1 %v703_v3  ;;  %714 = vmatpush.bf16.msra.mxu3 %v703_v3  ;;  %v603_v16 = vld [vmem:[%s1038_s0] sm:$0xf]  ;;  %v686_v17 = vld [vmem:[%s1038_s0 + $0x4] sm:$0xf0]  ;;  %v688_v19 = vld [vmem:[%s1038_s0 + $0x14] sm:$0xf0] }
  0x24   : > { %v685_v20 = vld [vmem:[%s1038_s0 + $0x4] sm:$0xf]  ;;  %v605_v21 = vld [vmem:[%s1038_s0 + $0x8] sm:$0xf0]  ;;  %v687_v22 = vld [vmem:[%s1038_s0 + $0x14] sm:$0xf]  ;;  %v604_v24 = vor.u32 %v686_v17, %v603_v16  ;;  %v612_v25 = vor.u32 %v688_v19, %v611_v18 }
  0x25   : > { %v613_v23 = vld [vmem:[%s1038_s0 + $0x18] sm:$0xf0]  ;;  %v608_v26 = vor.u32 %v685_v20, %v605_v21  ;;  %v779_v28 = vld [vmem:[%s238_s27] ss:$0 sm:$0xff] }
  0x26   : > { %398 = vmatpush.bf16.msra.mxu0 %v694_v4  ;;  %707 = vmatpush.bf16.msra.mxu2 %v694_v4  ;;  %v616_v27 = vor.u32 %v687_v22, %v613_v23 }
  0x27   : > { %417 = vmatpush.bf16.msra.mxu1 %v702_v5  ;;  %715 = vmatpush.bf16.msra.mxu3 %v702_v5 }
  0x2a   : > { %399 = vmatpush.bf16.msra.mxu0 %v693_v6  ;;  %708 = vmatpush.bf16.msra.mxu2 %v693_v6 }
  0x2b   : > { %418 = vmatpush.bf16.msra.mxu1 %v701_v7  ;;  %716 = vmatpush.bf16.msra.mxu3 %v701_v7 }
  0x2e   : > { %400 = vmatpush.bf16.msra.mxu0 %v692_v8  ;;  %709 = vmatpush.bf16.msra.mxu2 %v692_v8 }
  0x2f   : > { %419 = vmatpush.bf16.msra.mxu1 %v700_v9  ;;  %717 = vmatpush.bf16.msra.mxu3 %v700_v9 }
  0x32   : > { %401 = vmatpush.bf16.msra.mxu0 %v691_v10  ;;  %710 = vmatpush.bf16.msra.mxu2 %v691_v10 }
  0x33   : > { %420 = vmatpush.bf16.msra.mxu1 %v699_v11  ;;  %718 = vmatpush.bf16.msra.mxu3 %v699_v11 }
  0x36   : > { %402 = vmatpush.bf16.msra.mxu0 %v690_v12  ;;  %711 = vmatpush.bf16.msra.mxu2 %v690_v12 }
  0x37   : > { %421 = vmatpush.bf16.msra.mxu1 %v698_v13  ;;  %719 = vmatpush.bf16.msra.mxu3 %v698_v13 }
  0x3a   : > { %403 = vmatpush.bf16.msra.mxu0 %v689_v14  ;;  %712 = vmatpush.bf16.msra.mxu2 %v689_v14 }
  0x3b   : > { %422 = vmatpush.bf16.msra.mxu1 %v697_v15  ;;  %720 = vmatpush.bf16.msra.mxu3 %v697_v15 }
  0x3d   : > { %404 = vmatmul.bf16.vlgmr.msra.gmra.mxu0 %v604_v24  ;;  %409 = vmatmul.bf16.vlgmr.msra.gmra.mxu2 %v612_v25 }
  0x3e   : > { %423 = vmatmul.bf16.vlgmr.msra.gmra.mxu1 %v608_v26  ;;  %428 = vmatmul.bf16.vlgmr.msra.gmra.mxu3 %v616_v27 }
  0xba   : > { %v405_v29 = vpop.f32.mrf.mxu0 }
  0xbb   : > { %v406_v30 = vadd.f32 %v779_v28, %v405_v29  ;;  %v424_v31 = vpop.f32.mrf.mxu1 }
  0xbd   : > { %v425_v32 = vadd.f32 %v424_v31, %v406_v30 }
  0xbf   : > { %434 = vst [vmem:[%s228_s4] sm:$0xff] %v425_v32 }
  0xc0   : > { %v410_v33 = vpop.f32.mrf.mxu2 }
  0xc1   : > { %v411_v34 = vadd.f32 %v779_v28, %v410_v33  ;;  %v429_v35 = vpop.f32.mrf.mxu3 }
  0xc2   : > { %v407_v36 = vpop.f32.mrf.mxu0 }
  0xc3   : > { %v430_v37 = vadd.f32 %v429_v35, %v411_v34  ;;  %v408_v38 = vadd.f32 %v779_v28, %v407_v36  ;;  %v426_v39 = vpop.f32.mrf.mxu1 }
  0xc5   : > { %436 = vst [vmem:[%s228_s4 + $0x10] sm:$0xff] %v430_v37  ;;  %v427_v40 = vadd.f32 %v426_v39, %v408_v38 }
  0xc6   : > { %v484_v45 = vld [vmem:[%s228_s4] sm:$0xff] (%p935_p9) }
  0xc7   : > { %435 = vst [vmem:[%s228_s4 + $0x8] sm:$0xff] %v427_v40 }
  0xc8   : > { %v412_v41 = vpop.f32.mrf.mxu2  ;;  %485 = vst [vmem:[%s449_s5] sm:$0xff] (%p935_p9), %v484_v45 }
  0xc9   : > { %v413_v42 = vadd.f32 %v779_v28, %v412_v41  ;;  %v431_v43 = vpop.f32.mrf.mxu3  ;;  %444 = sbr.rel (!%p935_p9) target bundleno = 214 (0xd6), region = 40 }
  0xcb   : > { %v432_v44 = vadd.f32 %v431_v43, %v413_v42 }
  0xcc   : > { %v488_v47 = vld [vmem:[%s228_s4 + $0x10] sm:$0xff] (%p935_p9) }
  0xcd   : > { %437 = vst [vmem:[%s228_s4 + $0x18] sm:$0xff] %v432_v44 }
  0xce   : > { %v486_v46 = vld [vmem:[%s228_s4 + $0x8] sm:$0xff]  ;;  %489 = vst [vmem:[%s449_s5 + $0x20] sm:$0xff] %v488_v47 }
  0xcf   : > { %487 = vst [vmem:[%s449_s5 + $0x10] sm:$0xff] %v486_v46 }
  0xd4   : > { %v490_v48 = vld [vmem:[%s228_s4 + $0x18] sm:$0xff] }
  0xd5   : > { %491 = vst [vmem:[%s449_s5 + $0x30] sm:$0xff] %v490_v48 }
  0xd6 PF: > { %s16_s17 = sadd.s32 1, %s860_s17   ;;  %s1045_s12 = smov %s844_s13 }
  0xd7   : > { %p13_p2 = scmp.ge.s32.totalorder %s16_s17, 4   ;;  %s1046_s13 = smov %s848_s14 }
  0xd8   : > { %s1047_s14 = smov %s933_s24  ;;  %s1048_s15 = smov %s856_s16 }
  0xd9   : > { %s1049_s16 = smov %s1051_s19  ;;  %15 = sbr.rel (!%p13_p2) target bundleno = 4 (0x4), region = 116 }
  0xde   :  { %507 = vsyncpa [#allocation3], 1 }
  0xdf   :  { %509 = vsyncpa [#allocation3 + $0x1], 1 }

</bundles_post_ra>
